<compile_context>
chip_gen: v7x
topology: tpu7x:2x2x1
jax: 0.10.0
libtpu: 0.0.40
codegen_flags: <defaults>
</compile_context>

<pallas_src>
import functools

import jax
import jax.numpy as jnp
from jax.experimental import pallas as pl
from jax.experimental.pallas import tpu as pltpu


def _pick_tile(dim, prefs=(512, 256, 128)):
    """Largest preferred tile that divides `dim`; else the full extent."""
    for p in prefs:
        if dim >= p and dim % p == 0:
            return p
    return dim  # full-extent blocks are always layout-legal


# -------------------- s = x2 + t  (materialized once, mem-bound) ------------
def _add_kernel(a_ref, b_ref, o_ref):
    o_ref[...] = a_ref[...] + b_ref[...]


def _add(a, b, *, tile_prefs=(512, 256, 128)):
    M, N = a.shape
    tm, tn = _pick_tile(M, tile_prefs), _pick_tile(N, tile_prefs)
    spec = pl.BlockSpec((tm, tn), lambda i, j: (i, j))
    return pl.pallas_call(
        _add_kernel,
        out_shape=jax.ShapeDtypeStruct((M, N), a.dtype),
        grid_spec=pltpu.PrefetchScalarGridSpec(
            num_scalar_prefetch=0,
            grid=(M // tm, N // tn),
            in_specs=[spec, spec],
            out_specs=spec,
        ),
        compiler_params=pltpu.CompilerParams(
            dimension_semantics=("parallel", "parallel")),
    )(a, b)


# -------------------- plain tiled matmul (accumulate into o_ref) ------------
def _matmul_kernel(a_ref, b_ref, o_ref):
    """One (i, j, k) grid step of a @ b; f32 accumulation directly into the
    resident output block (no scratch accumulator)."""
    @pl.when(pl.program_id(2) == 0)
    def _():
        o_ref[...] = jnp.zeros_like(o_ref)

    o_ref[...] += jnp.dot(a_ref[...], b_ref[...],
                          preferred_element_type=jnp.float32)


def _matmul(a, b, *, tile_prefs=(512, 256, 128)):
    M, K = a.shape
    K2, N = b.shape
    assert K == K2
    tm = _pick_tile(M, tile_prefs)
    tn = _pick_tile(N, tile_prefs)
    tk = _pick_tile(K, tile_prefs)
    grid = (M // tm, N // tn, K // tk)

    flops = 2 * M * N * K
    # A is re-read N/tn times, B re-read M/tm times (tiling reuse).
    bytes_accessed = 4 * (M * K * grid[1] + K * N * grid[0] + M * N)

    return pl.pallas_call(
        _matmul_kernel,
        out_shape=jax.ShapeDtypeStruct((M, N), jnp.float32),
        grid_spec=pltpu.PrefetchScalarGridSpec(
            num_scalar_prefetch=0,
            grid=grid,
            in_specs=[pl.BlockSpec((tm, tk), lambda i, j, k: (i, k)),
                      pl.BlockSpec((tk, tn), lambda i, j, k: (k, j))],
            out_specs=pl.BlockSpec((tm, tn), lambda i, j, k: (i, j)),
        ),
        compiler_params=pltpu.CompilerParams(
            dimension_semantics=("parallel", "parallel", "arbitrary"),
            vmem_limit_bytes=48 * 1024 * 1024),
        cost_estimate=pl.CostEstimate(
            flops=flops, transcendentals=0, bytes_accessed=bytes_accessed),
    )(a, b)


# -------------------- fully fused single-call path (small/medium N) ---------
def _fused_chain_kernel(x2_ref, t_ref, o_ref, *, tm):
    i = pl.program_id(0)
    row0 = pl.multiple_of(i * tm, tm)
    # s = x2 + t stays resident in VMEM (RHS of the second matmul).
    s_full = x2_ref[...] + t_ref[...]
    # Row block of s for this grid step (LHS of the first matmul).
    s_rows = x2_ref[pl.ds(row0, tm), :] + t_ref[pl.ds(row0, tm), :]
    # v1 rows = s_rows @ t ;  out rows = v1_rows @ s  -- v1 never leaves VMEM.
    v1 = jnp.dot(s_rows, t_ref[...], preferred_element_type=jnp.float32)
    o_ref[...] = jnp.dot(v1, s_full,
                         preferred_element_type=jnp.float32).astype(o_ref.dtype)


def _fused_chain(x2, t):
    N = x2.shape[0]
    # >= 2 parallel row blocks so both v7x TensorCores have work (v5e/v6e: 1 TC,
    # the extra step is negligible).
    grid_m = 2 if (N % 16 == 0 and N >= 16) else 1
    tm = N // grid_m

    full_spec = pl.BlockSpec((N, N), lambda i: (0, 0))  # resident, not re-DMAed
    flops = 4 * N * N * N + 2 * N * N
    bytes_accessed = 4 * 3 * N * N  # x2 + t read once, out written once

    return pl.pallas_call(
        functools.partial(_fused_chain_kernel, tm=tm),
        out_shape=jax.ShapeDtypeStruct((N, N), jnp.float32),
        grid_spec=pltpu.PrefetchScalarGridSpec(
            num_scalar_prefetch=0,
            grid=(grid_m,),
            in_specs=[full_spec, full_spec],
            out_specs=pl.BlockSpec((tm, N), lambda i: (i, 0)),
        ),
        compiler_params=pltpu.CompilerParams(
            dimension_semantics=("parallel",),
            vmem_limit_bytes=48 * 1024 * 1024),
        cost_estimate=pl.CostEstimate(
            flops=flops, transcendentals=0, bytes_accessed=bytes_accessed),
    )(x2, t)


# -------------------- public entry point -------------------------------------
def addmm_chain(x2, t, *, force_tiled=False, tile_prefs=(512, 256, 128)):
    """v4 = v1 @ x2 + v1 @ t  with  v1 = (x2 + t) @ t   (== v1 @ (x2 + t))."""
    assert x2.ndim == 2 and x2.shape == t.shape
    M, N = x2.shape
    assert M == N, "the addmm chain (mm(v1, x2)) requires square inputs"

    # Fully resident single-call variant when everything fits VMEM comfortably
    # (~5*N^2*4 B working set; N <= 1024 keeps it well under 48 MiB on v7x).
    if N <= 1024 and not force_tiled:
        return _fused_chain(x2, t)

    # Large-N fallback: materialize s once, then two plain 2-operand matmuls.
    s = _add(x2, t, tile_prefs=tile_prefs)
    v1 = _matmul(s, t, tile_prefs=tile_prefs)
    return _matmul(v1, s, tile_prefs=tile_prefs)


if __name__ == "__main__":
    N = 256  # small, lane-dense demo size (multiple of 128)
    key = jax.random.PRNGKey(0)
    kx, kt = jax.random.split(key)
    x2 = jax.random.normal(kx, (N, N), dtype=jnp.float32)
    t = jax.random.normal(kt, (N, N), dtype=jnp.float32)

    # Plain-JAX reference of the original three-matmul chain.
    v1_ref = (x2 + t) @ t
    ref = v1_ref @ x2 + v1_ref @ t
    scale = jnp.max(jnp.abs(ref))

    # 1) fully fused single-call path (default for small N)
    out_fused = addmm_chain(x2, t)
    jax.block_until_ready(out_fused)
    err = jnp.max(jnp.abs(out_fused - ref))
    assert err <= 1e-3 * scale, ("fused path", float(err), float(scale))

    # 2) two-stage tiled path (forced; 128 tiles -> (2,2,2) grid exercises the
    #    k-accumulation into the resident output block)
    out_tiled = addmm_chain(x2, t, force_tiled=True, tile_prefs=(128,))
    jax.block_until_ready(out_tiled)
    err = jnp.max(jnp.abs(out_tiled - ref))
    assert err <= 1e-3 * scale, ("tiled path", float(err), float(scale))

    print("KERNEL_OK")
</pallas_src>

<mosaic_0001>
module attributes {stable_mosaic.version = 11 : i64} {
  func.func @_fused_chain_kernel(%arg0: i32, %arg1: memref<256x256xf32, #tpu.memory_space<vmem>>, %arg2: memref<256x256xf32, #tpu.memory_space<vmem>>, %arg3: memref<128x256xf32, #tpu.memory_space<vmem>>) attributes {dimension_semantics = [#tpu.dimension_semantics<parallel>], iteration_bounds = array<i64: 2>, scalar_prefetch = 0 : i64, scratch_operands = 0 : i64, tpu.core_type = #tpu.core_type<tc>, window_params = [{pipeline_mode = #tpu.pipeline_mode<synchronous>, transform_indices = @transform_0, window_bounds = array<i64: 256, 256>}, {pipeline_mode = #tpu.pipeline_mode<synchronous>, transform_indices = @transform_1, window_bounds = array<i64: 256, 256>}, {transform_indices = @transform_2, window_bounds = array<i64: 128, 256>}]} {
    %c128_i32 = arith.constant 128 : i32
    %0 = arith.muli %arg0, %c128_i32 : i32
    %1 = tpu.assume_multiple %0, 128 : i32
    %c0 = arith.constant 0 : index
    %c0_0 = arith.constant 0 : index
    %2 = vector.load %arg1[%c0, %c0_0] : memref<256x256xf32, #tpu.memory_space<vmem>>, vector<256x256xf32>
    %c0_1 = arith.constant 0 : index
    %c0_2 = arith.constant 0 : index
    %3 = vector.load %arg2[%c0_1, %c0_2] : memref<256x256xf32, #tpu.memory_space<vmem>>, vector<256x256xf32>
    %4 = arith.addf %2, %3 : vector<256x256xf32>
    %5 = arith.index_cast %1 : i32 to index
    %c0_3 = arith.constant 0 : index
    %6 = vector.load %arg1[%5, %c0_3] : memref<256x256xf32, #tpu.memory_space<vmem>>, vector<128x256xf32>
    %7 = arith.index_cast %1 : i32 to index
    %c0_4 = arith.constant 0 : index
    %8 = vector.load %arg2[%7, %c0_4] : memref<256x256xf32, #tpu.memory_space<vmem>>, vector<128x256xf32>
    %9 = arith.addf %6, %8 : vector<128x256xf32>
    %c0_5 = arith.constant 0 : index
    %c0_6 = arith.constant 0 : index
    %10 = vector.load %arg2[%c0_5, %c0_6] : memref<256x256xf32, #tpu.memory_space<vmem>>, vector<256x256xf32>
    %cst = arith.constant dense<0.000000e+00> : vector<128x256xf32>
    %11 = tpu.matmul %9, %10, %cst {dimension_numbers = #tpu.dot_dimension_numbers<[1], [0], [0], [1], [0, 0, 1, 1], [], []>} : vector<128x256xf32>, vector<256x256xf32>, vector<128x256xf32> -> vector<128x256xf32>
    %cst_7 = arith.constant dense<0.000000e+00> : vector<128x256xf32>
    %12 = tpu.matmul %11, %4, %cst_7 {dimension_numbers = #tpu.dot_dimension_numbers<[1], [0], [0], [1], [0, 0, 1, 1], [], []>} : vector<128x256xf32>, vector<256x256xf32>, vector<128x256xf32> -> vector<128x256xf32>
    %c0_8 = arith.constant 0 : index
    %c0_9 = arith.constant 0 : index
    %13 = vector.load %arg3[%c0_8, %c0_9] : memref<128x256xf32, #tpu.memory_space<vmem>>, vector<128x256xf32>
    tpu.vector_store %arg3[%c0_8, %c0_9], %12 {strides = array<i32>} : memref<128x256xf32, #tpu.memory_space<vmem>>, vector<128x256xf32>,
    return
  }
  func.func @transform_0(%arg0: i32) -> (i32, i32) {
    %c0_i32 = arith.constant 0 : i32
    %c0_i32_0 = arith.constant 0 : i32
    %c0_i32_1 = arith.constant 0 : i32
    return %c0_i32, %c0_i32_0 : i32, i32
  }
  func.func @transform_1(%arg0: i32) -> (i32, i32) {
    %c0_i32 = arith.constant 0 : i32
    %c0_i32_0 = arith.constant 0 : i32
    %c0_i32_1 = arith.constant 0 : i32
    return %c0_i32, %c0_i32_0 : i32, i32
  }
  func.func @transform_2(%arg0: i32) -> (i32, i32) {
    %c0_i32 = arith.constant 0 : i32
    %c0_i32_0 = arith.constant 0 : i32
    return %arg0, %c0_i32 : i32, i32
  }
}

</mosaic_0001>

<bundles_post_ra>
// kernel: tpu_custom_call.1
= control target key start
LH: loop header
LB: loop body
LE: loop exit
PB: predicated region body
PF: predicated region fallthrough
CT: control target
= control target key end

     0   :  { %7 = vsyncpa [#allocation3], 0  ;;  %s1852_s0 = inlined_call_operand.hbm [shape: f32[256,256], index: 0, kind: input, shape index: {}]   ;;  %s1853_s1 = inlined_call_operand.hbm [shape: f32[256,256], index: 1, kind: input, shape index: {}]   ;;  %s1854_s2 = inlined_call_operand.hbm [shape: f32[256,256], index: 2, kind: output, shape index: {}]  }
   0x1   :  { %8 = vsyncpa [#allocation6], 0 }
   0x2   :  { %9 = vsyncpa [#allocation4], 0 }
   0x3   :  { %11 = vsyncpa [#allocation4 + $0x1], 0  ;;  %s1258_s9 = smov 0   ;;  %s1260_s10 = smov 0  }
   0x4   :  { %s1262_s11 = smov 0   ;;  %s1264_s12 = smov 0  }
   0x5 LB: > { %s1279_s13 = sadd.s32 4294967295, %s1234_s12   ;;  %s894_s14 = sadd.s32 4294967294, %s1234_s12   ;;  %s1234_s12 = sphi %s1264_s12, %s1942_s12   ;;  %s1230_s11 = sphi %s1262_s11, %s1941_s11   ;;  %s1226_s10 = sphi %s1260_s10, %s1940_s10   ;;  %s1222_s9 = sphi %s1258_s9, %s1939_s9  }
   0x6   : > { %s1283_s15 = sadd.s32 1, %s1234_s12   ;;  %s66_s16 = sadd.s32 1, %s1230_s11 }
   0x7   : > { %s63_s17 = ssub.s32 %s1234_s12, %s1283_s15  ;;  %p76_p0 = scmp.ne.s32.totalorder %s1230_s11, %s1226_s10 }
   0x8   : > { %p64_p1 = scmp.eq.s32.totalorder %s63_s17, 0  ;;  %p77_p2 = scmp.eq.s32.totalorder %s1279_s13, 1 }
   0x9   : > { %p82_p3 = scmp.ne.s32.totalorder %s1226_s10, %s1222_s9  ;;  %p83_p4 = scmp.eq.s32.totalorder %s894_s14, 1 }
   0xa   : > { %s1294_s18 = scalar_select %p64_p1, %s1230_s11, %s66_s16  }
   0xb   : > { %p1296_p5 = por %p77_p2, %p76_p0  ;;  %p1300_p6 = por %p83_p4, %p82_p3 }
   0xc   : > { %p895_p7 = scmp.ge.s32.totalorder %s1234_s12, 1  ;;  %p90_p8 = scmp.lt.s32.totalorder %s1234_s12, 3 }
   0xd   : > { %s1868_s19 = scalar_select %p1296_p5, 1, 0 }
   0xe   : > { %s1869_s20 = scalar_select %p1300_p6, 1, 0 }
   0xf   : > { %p1855_p9 = scmp.eq.s32.totalorder %s1279_s13, 0  ;;  %p1307_p10 = pnand %p895_p7, %p90_p8 }
  0x10   : > { %s1236_s22 = smov [#allocation2]   ;;  %s1237_s25 = smov [#allocation5]  }
  0x11   : > { %s1870_s21 = scalar_select %p1307_p10, 1, 0 }
  0x12   : > { %s102_s23 = sshll.u32 %s1236_s22, 4  ;;  %p1054_p11 = pneg %p1307_p10  ;;  %s103_s23 = int_to_ptr.vmem [resolvable:$true] %s102_s23 }
  0x13   : > { %s115_s26 = sshll.u32 %s1237_s25, 4  ;;  %s1108_s29 = scalar_lea.hbm %s1852_s0, 8192  ;;  %s1319_s26 = int_to_ptr.vmem [resolvable:$true] %s115_s26 }
  0x14   : > { %p1315_p12 = pnand %p1855_p9, %p1054_p11  ;;  %p1109_p13 = scmp.ne.s32.totalorder %s1852_s0, %s1108_s29 }
  0x15   : > { %p1115_p3 = scmp.lt.u32.totalorder %s1108_s29, %s1852_s0 }
  0x16   : > { %p1110_p0 = pneg %p1315_p12 }
  0x18   : > { %p1111_p1 = pnand %p1110_p0, %p1109_p13 }
  0x1a   : > { %p1112_p2 = pneg %p1111_p1 }
  0x1c   : > { %p1117_p4 = pnand %p1115_p3, %p1112_p2 }
  0x1e   : > { %1120 = shalt.err (!%p1117_p4)
}
  0x1f   : > { %s1121_s6 = scalar_lea.vmem %s103_s23, 8192  ;;  %p1129_p9 = scmp.lt.s32.totalorder %s103_s23, %s103_s23 }
  0x20   : > { %p1122_p7 = scmp.ne.s32.totalorder %s103_s23, %s1121_s6  ;;  %p1130_p6 = scmp.lt.s32.totalorder %s1121_s6, %s1121_s6 }
  0x22   : > { %p1124_p8 = pnand %p1122_p7, %p1110_p0  ;;  %p1131_p5 = por %p1130_p6, %p1129_p9 }
  0x24   : > { %p1125_p11 = pneg %p1124_p8 }
  0x26   : > { %p1132_p10 = pnand %p1131_p5, %p1125_p11 }
  0x28   : > { %1135 = shalt.err (!%p1132_p10)
}
  0x29   : > { %s1238_s7 = smov 256   ;;  %s1239_s8 = smov 16  }
  0x2a   : > { %1057 = dma.hbm_to_vmem [thread:$0]  (!%p1315_p12), %s1852_s0, 8192, %s103_s23, [#allocation3], %s1238_s7, %s1238_s7, %s1239_s8  }
  0x2b   : > { %s1136_s25 = scalar_lea.hbm %s1853_s1, 8192 }
  0x2c   : > { %p1137_p13 = scmp.ne.s32.totalorder %s1853_s1, %s1136_s25  ;;  %p1143_p9 = scmp.lt.u32.totalorder %s1136_s25, %s1853_s1 }
  0x2e   : > { %p1139_p5 = pnand %p1137_p13, %p1110_p0 }
  0x30   : > { %p1140_p6 = pneg %p1139_p5 }
  0x32   : > { %p1145_p10 = pnand %p1143_p9, %p1140_p6 }
  0x34   : > { %1148 = shalt.err (!%p1145_p10)
}
  0x35   : > { %s1149_s23 = scalar_lea.vmem %s1319_s26, 8192  ;;  %p1157_p4 = scmp.lt.s32.totalorder %s1319_s26, %s1319_s26 }
  0x36   : > { %p1150_p1 = scmp.ne.s32.totalorder %s1319_s26, %s1149_s23  ;;  %p1158_p7 = scmp.lt.s32.totalorder %s1149_s23, %s1149_s23 }
  0x38   : > { %p1152_p2 = pnand %p1150_p1, %p1110_p0  ;;  %p1159_p8 = por %p1158_p7, %p1157_p4 }
  0x3a   : > { %p1153_p3 = pneg %p1152_p2 }
  0x3c   : > { %p1160_p11 = pnand %p1159_p8, %p1153_p3 }
  0x3e   : > { %1163 = shalt.err (!%p1160_p11)
}
  0x3f   : > { %1060 = dma.hbm_to_vmem [thread:$0]  (!%p1315_p12), %s1853_s1, 8192, %s1319_s26, [#allocation6], %s1238_s7, %s1238_s7, %s1239_s8  }
  0x40   : > { %p1872_p13 = scmp.ne.s32.totalorder %s1870_s21, 0 }
  0x42   : > { %131 = sbr.rel (%p1872_p13) target bundleno = 649 (0x289), region = 28 }
  0x49   : > { %p1873_p5 = scmp.eq.s32.totalorder %s1279_s13, 0 }
  0x4b   : > { %1209 = dma.done.wait (%p1873_p5), [#allocation3], 8192   ;;  %p1874_p0 = pmov %p1873_p5 }
  0x4d   : > { %1211 = vsyncadd (%p1874_p0), [#allocation3], 4294959104  ;;  %p1875_p6 = pmov %p1874_p0 }
  0x4e   : > { %p1876_p9 = pmov %p1874_p0 }
  0x4f   : > { %1213 = dma.done.wait (%p1875_p6), [#allocation6], 8192  }
  0x50   : > { %1215 = vsyncadd (%p1876_p9), [#allocation6], 4294959104  ;;  %v1378_v0 = vld [vmem:[#allocation5 + $0x8] sm:$0xff]  ;;  %v1380_v1 = vld [vmem:[#allocation5 + $0x18] sm:$0xff]  ;;  %s902_s21 = sshll.u32 %s1279_s13, 7  ;;  %s149_s7 = sand.u32 1, %s1226_s10  }
  0x51   : > { %v1382_v2 = vld [vmem:[#allocation5] sm:$0xff]  ;;  %v916_v3 = vpack.c.bf16 %v1380_v1, %v1378_v0  ;;  %v1386_v4 = vld [vmem:[#allocation5 + $0x10] sm:$0xff]  ;;  %v1388_v5 = vld [vmem:[#allocation5 + $0x28] sm:$0xff]  ;;  %s346_s24 = sshra.s32 %s902_s21, 3  ;;  %s901_s8 = sshll.u32 %s149_s7, 8 }
  0x52   : > { %v1390_v6 = vld [vmem:[#allocation5 + $0x38] sm:$0xff]  ;;  %v918_v7 = vpack.c.bf16 %v1386_v4, %v1382_v2  ;;  %v1396_v9 = vld [vmem:[#allocation5 + $0x20] sm:$0xff]  ;;  %v1398_v10 = vld [vmem:[#allocation5 + $0x30] sm:$0xff]  ;;  %s912_s26 = sshll.u32 %s346_s24, 4  ;;  %s1766_s14 = scalar_lea.vmem [#allocation7], %s901_s8 }
  0x53   : > { %v920_v8 = vpack.c.bf16 %v1390_v6, %v1388_v5  ;;  %v1400_v11 = vld [vmem:[#allocation5 + $0x48] sm:$0xff]  ;;  %917 = vmatprep.subr.bf16.mxu0 %v916_v3  ;;  %v1402_v12 = vld [vmem:[#allocation5 + $0x58] sm:$0xff]  ;;  %v922_v13 = vpack.c.bf16 %v1398_v10, %v1396_v9  ;;  %v1408_v15 = vld [vmem:[#allocation5 + $0x40] sm:$0xff]  ;;  %s1461_s5 = scalar_lea.vmem [#allocation2], %s912_s26  ;;  %s1464_s6 = scalar_lea.vmem [#allocation5], %s912_s26 }
  0x54   : > { %919 = vmatpush1.bf16.msra.mxu0 %v918_v7  ;;  %v924_v14 = vpack.c.bf16 %v1402_v12, %v1400_v11  ;;  %v1410_v16 = vld [vmem:[#allocation5 + $0x50] sm:$0xff]  ;;  %v1412_v17 = vld [vmem:[#allocation5 + $0x68] sm:$0xff]  ;;  %v1414_v18 = vld [vmem:[#allocation5 + $0x78] sm:$0xff]  ;;  %s915_s16 = sshll.u32 %s1279_s13, 12  ;;  %s818_s17 = sshll.u32 %s1766_s14, 4  ;;  %s1805_s17 = int_to_ptr.vmem [resolvable:$true] %s818_s17 }
  0x55   : > { %921 = vmatprep.subr.bf16.mxu0 %v920_v8  ;;  %v926_v19 = vpack.c.bf16 %v1410_v16, %v1408_v15  ;;  %v928_v20 = vpack.c.bf16 %v1414_v18, %v1412_v17  ;;  %v1420_v21 = vld [vmem:[#allocation5 + $0x60] sm:$0xff]  ;;  %v1422_v22 = vld [vmem:[#allocation5 + $0x70] sm:$0xff]  ;;  %v1425_v23 = vld [vmem:[#allocation5 + $0x88] sm:$0xff]  ;;  %s1803_s27 = scalar_lea.hbm %s1854_s2, %s915_s16  ;;  %s1811_s13 = scalar_lea.sflag [#allocation4], %s149_s7 }
  0x56   : > { %v1427_v24 = vld [vmem:[#allocation5 + $0x98] sm:$0xff]  ;;  %v930_v25 = vpack.c.bf16 %v1422_v22, %v1420_v21  ;;  %v1433_v27 = vld [vmem:[#allocation5 + $0x80] sm:$0xff]  ;;  %v1435_v28 = vld [vmem:[#allocation5 + $0x90] sm:$0xff]  ;;  %s1164_s28 = scalar_lea.vmem %s1805_s17, 4096  ;;  %p1937_p10 = scmp.ne.s32.totalorder %s1868_s19, 0 }
  0x57   : > { %v932_v26 = vpack.c.bf16 %v1427_v24, %v1425_v23  ;;  %v1437_v29 = vld [vmem:[#allocation5 + $0xa8] sm:$0xff]  ;;  %v1439_v30 = vld [vmem:[#allocation5 + $0xb8] sm:$0xff]  ;;  %v934_v31 = vpack.c.bf16 %v1435_v28, %v1433_v27  ;;  %v1445_v33 = vld [vmem:[#allocation5 + $0xa0] sm:$0xff]  ;;  %p1165_p12 = scmp.ne.s32.totalorder %s1805_s17, %s1164_s28  ;;  %s1240_s29 = smov [#allocation7]  }
  0x58   : > { %923 = vmatpush1.bf16.msra.mxu0 %v922_v13  ;;  %v936_v32 = vpack.c.bf16 %v1439_v30, %v1437_v29  ;;  %v1447_v34 = vld [vmem:[#allocation5 + $0xb0] sm:$0xff]  ;;  %v1449_v35 = vld [vmem:[#allocation5 + $0xc8] sm:$0xff]  ;;  %v1451_v36 = vld [vmem:[#allocation5 + $0xd8] sm:$0xff]  ;;  %s1168_s30 = sshll.u32 %s1240_s29, 4  ;;  %s1169_s30 = int_to_ptr.vmem [resolvable:$false] %s1168_s30 }
  0x59   : > { %925 = vmatprep.subr.bf16.mxu0 %v924_v14  ;;  %v938_v37 = vpack.c.bf16 %v1447_v34, %v1445_v33  ;;  %v1455_v38 = vld [vmem:[#allocation5 + $0xc0] sm:$0xff]  ;;  %v940_v39 = vpack.c.bf16 %v1451_v36, %v1449_v35  ;;  %v1459_v40 = vld [vmem:[#allocation5 + $0xd0] sm:$0xff]  ;;  %v352_v41 = vld [vmem:[%s1461_s5 + $0x8] sm:$0xff]  ;;  %p1166_p1 = pnand %p1165_p12, %p1937_p10  ;;  %s1170_s23 = scalar_lea.vmem %s1169_s30, 8192 }
  0x5a   : > { %v386_v42 = vld [vmem:[%s1464_s6 + $0x8] sm:$0xff]  ;;  %v1469_v44 = vld [vmem:[#allocation5 + $0xf8] sm:$0xff]  ;;  %v942_v46 = vpack.c.bf16 %v1459_v40, %v1455_v38  ;;  %v1475_v48 = vld [vmem:[#allocation5 + $0xe0] sm:$0xff]  ;;  %p1171_p3 = scmp.lt.s32.totalorder %s1805_s17, %s1169_s30  ;;  %p1172_p4 = scmp.lt.s32.totalorder %s1170_s23, %s1164_s28 }
  0x5b   : > { %v1467_v43 = vld [vmem:[#allocation5 + $0xe8] sm:$0xff]  ;;  %v418_v45 = vadd.f32 %v386_v42, %v352_v41  ;;  %v1477_v49 = vld [vmem:[#allocation5 + $0xf0] sm:$0xff]  ;;  %v1481_v51 = vld [vmem:[#allocation5 + $0x118] sm:$0xff]  ;;  %p1167_p2 = pneg %p1166_p1 }
  0x5c   : > { %927 = vmatpush1.bf16.msra.mxu0 %v926_v19  ;;  %v944_v47 = vpack.c.bf16 %v1469_v44, %v1467_v43  ;;  %v1479_v50 = vld [vmem:[#allocation5 + $0x108] sm:$0xff]  ;;  %v946_v52 = vpack.c.bf16 %v1477_v49, %v1475_v48  ;;  %v1485_v53 = vld [vmem:[#allocation5 + $0x100] sm:$0xff]  ;;  %v1487_v54 = vld [vmem:[#allocation5 + $0x110] sm:$0xff]  ;;  %p1173_p7 = por %p1172_p4, %p1171_p3 }
  0x5d   : > { %929 = vmatprep.subr.bf16.mxu0 %v928_v20  ;;  %513 = vmatprep.mubr.f32.mxu0 %v418_v45  ;;  %v1489_v55 = vld [vmem:[#allocation5 + $0x128] sm:$0xff]  ;;  %v948_v56 = vpack.c.bf16 %v1481_v51, %v1479_v50  ;;  %v1493_v57 = vld [vmem:[#allocation5 + $0x138] sm:$0xff]  ;;  %v363_v61 = vld [vmem:[%s1461_s5 + $0x60] sm:$0xff]  ;;  %v950_v20 = vpack.c.bf16 %v1487_v54, %v1485_v53 }
  0x5e   : > { %v364_v58 = vld [vmem:[%s1461_s5 + $0x68] sm:$0xff]  ;;  %v397_v62 = vld [vmem:[%s1464_s6 + $0x60] sm:$0xff]  ;;  %v366_v63 = vld [vmem:[%s1461_s5 + $0x78] sm:$0xff]  ;;  %v952_v42 = vpack.c.bf16 %v1493_v57, %v1489_v55  ;;  %p1174_p8 = pnand %p1173_p7, %p1167_p2 }
  0x5f   : > { %v398_v59 = vld [vmem:[%s1464_s6 + $0x68] sm:$0xff]  ;;  %v1502_v3 = vld [vmem:[#allocation5 + $0x120] sm:$0xff]  ;;  %v1504_v7 = vld [vmem:[#allocation5 + $0x130] sm:$0xff]  ;;  %v1506_v8 = vadd.f32 %v397_v62, %v363_v61 }
  0x60   : > { %931 = vmatpush1.bf16.msra.mxu0 %v930_v25  ;;  %v1497_v60 = vadd.f32 %v398_v59, %v364_v58  ;;  %1878 = vst [vmem:[#allocation12_spill] sm:$0xff] %v1504_v7  ;;  %v400_v13 = vld [vmem:[%s1464_s6 + $0x78] sm:$0xff]  ;;  %v365_v14 = vld [vmem:[%s1461_s5 + $0x70] sm:$0xff]  ;;  %v1513_v25 = vld [vmem:[#allocation5 + $0x148] sm:$0xff] }
  0x61   : > { %933 = vmatprep.subr.bf16.mxu0 %v932_v26  ;;  %1879 = vst [vmem:[#allocation13_spill] sm:$0xff] %v1506_v8  ;;  %v399_v19 = vld [vmem:[%s1464_s6 + $0x70] sm:$0xff]  ;;  %1880 = vst [vmem:[#allocation14_spill] sm:$0xff] %v1513_v25  ;;  %v1515_v26 = vld [vmem:[#allocation5 + $0x158] sm:$0xff] }
  0x62   : > { %1877 = vst [vmem:[#allocation11_spill] sm:$0xff] %v1497_v60  ;;  %1881 = vst [vmem:[#allocation15_spill] sm:$0xff] %v1515_v26  ;;  %v367_v41 = vld [vmem:[%s1461_s5 + $0x80] sm:$0xff]  ;;  %v369_v61 = vld [vmem:[%s1461_s5 + $0x90] sm:$0xff] }
  0x63   : > { %v403_v62 = vld [vmem:[%s1464_s6 + $0x90] sm:$0xff]  ;;  %v413_v60 = vld [vmem:[%s1464_s6 + $0xe0] sm:$0xff] }
  0x64   : > { %935 = vmatpush1.bf16.msra.mxu0 %v934_v31  ;;  %v1517_v31 = vadd.f32 %v400_v13, %v366_v63  ;;  %v372_v63 = vld [vmem:[%s1461_s5 + $0xa8] sm:$0xff]  ;;  %v1540_v13 = vld [vmem:[#allocation5 + $0x150] sm:$0xff] }
  0x65   : > { %937 = vmatprep.subr.bf16.mxu0 %v936_v32  ;;  %v1519_v32 = vadd.f32 %v399_v19, %v365_v14  ;;  %1888 = vst [vmem:[#allocation22_spill] sm:$0xff] %v1540_v13  ;;  %v1542_v14 = vadd.f32 %v403_v62, %v369_v61  ;;  %v406_v19 = vld [vmem:[%s1464_s6 + $0xa8] sm:$0xff]  ;;  %v374_v62 = vld [vmem:[%s1461_s5 + $0xb8] sm:$0xff] }
  0x66   : > { %1882 = vst [vmem:[#allocation16_spill] sm:$0xff] %v1517_v31  ;;  %v410_v31 = vld [vmem:[%s1464_s6 + $0xc8] sm:$0xff] }
  0x67   : > { %1883 = vst [vmem:[#allocation17_spill] sm:$0xff] %v1519_v32  ;;  %1889 = vst [vmem:[#allocation23_spill] sm:$0xff] %v1542_v14  ;;  %v408_v14 = vld [vmem:[%s1464_s6 + $0xb8] sm:$0xff]  ;;  %v376_v32 = vld [vmem:[%s1461_s5 + $0xc8] sm:$0xff] }
  0x68   : > { %939 = vmatpush1.bf16.msra.mxu0 %v938_v37  ;;  %v368_v37 = vld [vmem:[%s1461_s5 + $0x88] sm:$0xff] }
  0x69   : > { %941 = vmatprep.subr.bf16.mxu0 %v940_v39  ;;  %v402_v39 = vld [vmem:[%s1464_s6 + $0x88] sm:$0xff] }
  0x6a   : > { %v1526_v45 = vadd.f32 %v402_v39, %v368_v37  ;;  %v371_v37 = vld [vmem:[%s1461_s5 + $0xa0] sm:$0xff] }
  0x6b   : > { %v405_v39 = vld [vmem:[%s1464_s6 + $0xa0] sm:$0xff] }
  0x6c   : > { %943 = vmatpush1.bf16.msra.mxu0 %v942_v46  ;;  %1884 = vst [vmem:[#allocation18_spill] sm:$0xff] %v1526_v45  ;;  %v401_v46 = vld [vmem:[%s1464_s6 + $0x80] sm:$0xff]  ;;  %v1555_v61 = vadd.f32 %v405_v39, %v371_v37  ;;  %v407_v45 = vld [vmem:[%s1464_s6 + $0xb0] sm:$0xff]  ;;  %v378_v39 = vld [vmem:[%s1461_s5 + $0xd8] sm:$0xff] }
  0x6d   : > { %945 = vmatprep.subr.bf16.mxu0 %v944_v47  ;;  %v370_v47 = vld [vmem:[%s1461_s5 + $0x98] sm:$0xff]  ;;  %v1531_v58 = vadd.f32 %v401_v46, %v367_v41  ;;  %v954_v41 = vpack.c.bf16 %v1504_v7, %v1502_v3  ;;  %v1549_v46 = vld [vmem:[#allocation5 + $0x168] sm:$0xff]  ;;  %v409_v37 = vld [vmem:[%s1464_s6 + $0xc0] sm:$0xff] }
  0x6e   : > { %1890 = vst [vmem:[#allocation24_spill] sm:$0xff] %v1549_v46  ;;  %1893 = vst [vmem:[#allocation27_spill] sm:$0xff] %v1555_v61  ;;  %v1576_v61 = vld [vmem:[#allocation5 + $0x170] sm:$0xff]  ;;  %v158_v7 = vld [vmem:[#allocation2 + $0x20] sm:$0xff] }
  0x6f   : > { %1885 = vst [vmem:[#allocation19_spill] sm:$0xff] %v1531_v58  ;;  %v1562_v58 = vadd.f32 %v408_v14, %v374_v62  ;;  %1897 = vst [vmem:[#allocation31_spill] sm:$0xff] %v1576_v61  ;;  %v412_v14 = vld [vmem:[%s1464_s6 + $0xd8] sm:$0xff]  ;;  %v377_v62 = vld [vmem:[%s1461_s5 + $0xd0] sm:$0xff] }
  0x70   : > { %947 = vmatpush1.bf16.msra.mxu0 %v946_v52  ;;  %v404_v52 = vld [vmem:[%s1464_s6 + $0x98] sm:$0xff] }
  0x71   : > { %949 = vmatprep.subr.bf16.mxu0 %v948_v56  ;;  %v1533_v59 = vadd.f32 %v404_v52, %v370_v47  ;;  %v1538_v56 = vld [vmem:[#allocation5 + $0x140] sm:$0xff]  ;;  %v1551_v47 = vld [vmem:[#allocation5 + $0x178] sm:$0xff]  ;;  %v1553_v52 = vadd.f32 %v406_v19, %v372_v63  ;;  %1894 = vst [vmem:[#allocation28_spill] sm:$0xff] %v1562_v58  ;;  %v1569_v63 = vadd.f32 %v410_v31, %v376_v32  ;;  %v1585_v32 = vld [vmem:[#allocation5 + $0x188] sm:$0xff] }
  0x72   : > { %1887 = vst [vmem:[#allocation21_spill] sm:$0xff] %v1538_v56  ;;  %1891 = vst [vmem:[#allocation25_spill] sm:$0xff] %v1551_v47  ;;  %v375_v19 = vld [vmem:[%s1461_s5 + $0xc0] sm:$0xff]  ;;  %v958_v31 = vpack.c.bf16 %v1540_v13, %v1538_v56  ;;  %v382_v13 = vld [vmem:[%s1461_s5 + $0xf8] sm:$0xff] }
  0x73   : > { %1886 = vst [vmem:[#allocation20_spill] sm:$0xff] %v1533_v59  ;;  %1892 = vst [vmem:[#allocation26_spill] sm:$0xff] %v1553_v52  ;;  %v373_v59 = vld [vmem:[%s1461_s5 + $0xb0] sm:$0xff]  ;;  %v1578_v52 = vadd.f32 %v409_v37, %v375_v19  ;;  %v380_v37 = vld [vmem:[%s1461_s5 + $0xe8] sm:$0xff] }
  0x74   : > { %951 = vmatpush1.bf16.msra.mxu0 %v950_v20  ;;  %v956_v20 = vpack.c.bf16 %v1515_v26, %v1513_v25  ;;  %v1567_v8 = vadd.f32 %v407_v45, %v373_v59  ;;  %1896 = vst [vmem:[#allocation30_spill] sm:$0xff] %v1569_v63  ;;  %v411_v45 = vld [vmem:[%s1464_s6 + $0xd0] sm:$0xff]  ;;  %1899 = vst [vmem:[#allocation33_spill] sm:$0xff] %v1585_v32  ;;  %v1587_v59 = vld [vmem:[#allocation5 + $0x198] sm:$0xff]  ;;  %v1589_v63 = vadd.f32 %v412_v14, %v378_v39 }
  0x75   : > { %953 = vmatprep.subr.bf16.mxu0 %v952_v42  ;;  %v1574_v42 = vld [vmem:[#allocation5 + $0x160] sm:$0xff]  ;;  %1898 = vst [vmem:[#allocation32_spill] sm:$0xff] %v1578_v52  ;;  %1900 = vst [vmem:[#allocation34_spill] sm:$0xff] %v1587_v59  ;;  %v1591_v19 = vadd.f32 %v411_v45, %v377_v62  ;;  %v414_v52 = vld [vmem:[%s1464_s6 + $0xe8] sm:$0xff] }
  0x76   : > { %1895 = vst [vmem:[#allocation29_spill] sm:$0xff] %v1567_v8  ;;  %1901 = vst [vmem:[#allocation35_spill] sm:$0xff] %v1589_v63  ;;  %v379_v8 = vld [vmem:[%s1461_s5 + $0xe0] sm:$0xff]  ;;  %v1598_v58 = vadd.f32 %v414_v52, %v380_v37  ;;  %v416_v56 = vld [vmem:[%s1464_s6 + $0xf8] sm:$0xff] }
  0x77   : > { %1902 = vst [vmem:[#allocation36_spill] sm:$0xff] %v1591_v19  ;;  %v1603_v26 = vadd.f32 %v413_v60, %v379_v8  ;;  %v1605_v25 = vadd.f32 %v416_v56, %v382_v13  ;;  %v381_v39 = vld [vmem:[%s1461_s5 + $0xf0] sm:$0xff]  ;;  %v155_v62 = vld [vmem:[#allocation2 + $0x8] sm:$0xff]  ;;  %v1609_v45 = vld [vmem:[#allocation5 + $0x180] sm:$0xff]  ;;  %v962_v56 = vpack.c.bf16 %v1576_v61, %v1574_v42 }
  0x78   : > { %955 = vmatpush1.bf16.msra.mxu0 %v954_v41  ;;  %v960_v41 = vpack.c.bf16 %v1551_v47, %v1549_v46  ;;  %1903 = vst [vmem:[#allocation37_spill] sm:$0xff] %v1598_v58  ;;  %v415_v14 = vld [vmem:[%s1464_s6 + $0xf0] sm:$0xff]  ;;  %v1615_v63 = vld [vmem:[#allocation5 + $0x1b8] sm:$0xff]  ;;  %v283_v58 = vadd.f32 %v1378_v0, %v155_v62  ;;  %v154_v60 = vld [vmem:[#allocation2] sm:$0xff]  ;;  %v286_v62 = vadd.f32 %v1396_v9, %v158_v7 }
  0x79   : > { %957 = vmatprep.subr.bf16.mxu0 %v956_v20  ;;  %1904 = vst [vmem:[#allocation38_spill] sm:$0xff] %v1603_v26  ;;  %1905 = vst [vmem:[#allocation39_spill] sm:$0xff] %v1605_v25  ;;  %v1611_v19 = vld [vmem:[#allocation5 + $0x190] sm:$0xff]  ;;  %v1613_v20 = vld [vmem:[#allocation5 + $0x1a8] sm:$0xff]  ;;  %v1617_v52 = vadd.f32 %v415_v14, %v381_v39  ;;  %v282_v25 = vadd.f32 %v1382_v2, %v154_v60  ;;  %v964_v39 = vpack.c.bf16 %v1587_v59, %v1585_v32 }
  0x7a   : > { %v157_v37 = vld [vmem:[#allocation2 + $0x18] sm:$0xff]  ;;  %v156_v8 = vld [vmem:[#allocation2 + $0x10] sm:$0xff]  ;;  %v159_v47 = vld [vmem:[#allocation2 + $0x28] sm:$0xff]  ;;  %v968_v9 = vpack.c.bf16 %v1615_v63, %v1613_v20 }
  0x7b   : > { %1906 = vst [vmem:[#allocation40_spill] sm:$0xff] %v1617_v52  ;;  %v285_v13 = vadd.f32 %v1380_v1, %v157_v37  ;;  %v284_v26 = vadd.f32 %v1386_v4, %v156_v8  ;;  %v161_v46 = vld [vmem:[#allocation2 + $0x38] sm:$0xff]  ;;  %v287_v0 = vadd.f32 %v1388_v5, %v159_v47  ;;  %v160_v14 = vld [vmem:[#allocation2 + $0x30] sm:$0xff]  ;;  %v163_v52 = vld [vmem:[#allocation2 + $0x48] sm:$0xff] }
  0x7c   : > { %959 = vmatpush1.bf16.msra.mxu0 %v958_v31  ;;  %v289_v31 = vadd.f32 %v1390_v6, %v161_v46  ;;  %v165_v1 = vld [vmem:[#allocation2 + $0x58] sm:$0xff]  ;;  %v288_v4 = vadd.f32 %v1398_v10, %v160_v14  ;;  %v291_v60 = vadd.f32 %v1400_v11, %v163_v52  ;;  %v162_v8 = vld [vmem:[#allocation2 + $0x40] sm:$0xff]  ;;  %v167_v32 = vld [vmem:[#allocation2 + $0x68] sm:$0xff]  ;;  %v966_v6 = vpack.c.bf16 %v1611_v19, %v1609_v45 }
  0x7d   : > { %961 = vmatprep.subr.bf16.mxu0 %v960_v41  ;;  %v980_v37 = vpack.c.bf16 %v285_v13, %v283_v58  ;;  %v982_v2 = vpack.c.bf16 %v284_v26, %v282_v25  ;;  %v164_v41 = vld [vmem:[#allocation2 + $0x50] sm:$0xff]  ;;  %v293_v59 = vadd.f32 %v1402_v12, %v165_v1  ;;  %v169_v5 = vld [vmem:[#allocation2 + $0x78] sm:$0xff]  ;;  %v1637_v7 = vld [vmem:[#allocation5 + $0x1a0] sm:$0xff]  ;;  %v290_v26 = vadd.f32 %v1408_v15, %v162_v8 }
  0x7e   : > { %v984_v61 = vpack.c.bf16 %v289_v31, %v287_v0  ;;  %v1639_v10 = vld [vmem:[#allocation5 + $0x1b0] sm:$0xff]  ;;  %v1641_v11 = vld [vmem:[#allocation5 + $0x1c8] sm:$0xff]  ;;  %v1643_v25 = vld [vmem:[#allocation5 + $0x1d8] sm:$0xff]  ;;  %v986_v12 = vpack.c.bf16 %v288_v4, %v286_v62  ;;  %v292_v58 = vadd.f32 %v1410_v16, %v164_v41  ;;  %v295_v47 = vadd.f32 %v1412_v17, %v167_v32 }
  0x7f   : > { %981 = vmatprep.subr.bf16.mxu1 %v980_v37  ;;  %v988_v46 = vpack.c.bf16 %v293_v59, %v291_v60  ;;  %v297_v52 = vadd.f32 %v1414_v18, %v169_v5  ;;  %v168_v13 = vld [vmem:[#allocation2 + $0x70] sm:$0xff]  ;;  %v173_v0 = vld [vmem:[#allocation2 + $0x98] sm:$0xff]  ;;  %v970_v31 = vpack.c.bf16 %v1639_v10, %v1637_v7  ;;  %v972_v14 = vpack.c.bf16 %v1643_v25, %v1641_v11  ;;  %v1653_v15 = vld [vmem:[#allocation5 + $0x1c0] sm:$0xff] }
  0x80   : > { %963 = vmatpush1.bf16.msra.mxu0 %v962_v56  ;;  %983 = vmatpush1.bf16.msra.mxu1 %v982_v2  ;;  %v166_v56 = vld [vmem:[#allocation2 + $0x60] sm:$0xff]  ;;  %v1655_v16 = vld [vmem:[#allocation5 + $0x1d0] sm:$0xff]  ;;  %v1659_v17 = vld [vmem:[#allocation5 + $0x1f8] sm:$0xff]  ;;  %v990_v18 = vpack.c.bf16 %v292_v58, %v290_v26  ;;  %v296_v59 = vadd.f32 %v1422_v22, %v168_v13  ;;  %v301_v37 = vadd.f32 %v1427_v24, %v173_v0 }
  0x81   : > { %965 = vmatprep.subr.bf16.mxu0 %v964_v39  ;;  %985 = vmatprep.subr.bf16.mxu1 %v984_v61  ;;  %v171_v39 = vld [vmem:[#allocation2 + $0x88] sm:$0xff]  ;;  %v294_v32 = vadd.f32 %v1420_v21, %v166_v56  ;;  %v992_v62 = vpack.c.bf16 %v297_v52, %v295_v47  ;;  %v170_v2 = vld [vmem:[#allocation2 + $0x80] sm:$0xff]  ;;  %v172_v4 = vld [vmem:[#allocation2 + $0x90] sm:$0xff]  ;;  %v974_v41 = vpack.c.bf16 %v1655_v16, %v1653_v15 }
  0x82   : > { %v1657_v61 = vld [vmem:[#allocation5 + $0x1e8] sm:$0xff]  ;;  %v299_v1 = vadd.f32 %v1425_v23, %v171_v39  ;;  %v177_v8 = vld [vmem:[#allocation2 + $0xb8] sm:$0xff]  ;;  %v1669_v21 = vld [vmem:[#allocation5 + $0x1e0] sm:$0xff]  ;;  %v298_v24 = vadd.f32 %v1433_v27, %v170_v2 }
  0x83   : > { %v175_v60 = vld [vmem:[#allocation2 + $0xa8] sm:$0xff]  ;;  %v976_v5 = vpack.c.bf16 %v1659_v17, %v1657_v61  ;;  %v1671_v22 = vld [vmem:[#allocation5 + $0x1f0] sm:$0xff]  ;;  %v994_v23 = vpack.c.bf16 %v296_v59, %v294_v32  ;;  %v305_v26 = vadd.f32 %v1439_v30, %v177_v8  ;;  %v174_v58 = vld [vmem:[#allocation2 + $0xa0] sm:$0xff] }
  0x84   : > { %967 = vmatpush1.bf16.msra.mxu0 %v966_v6  ;;  %987 = vmatpush1.bf16.msra.mxu1 %v986_v12  ;;  %v300_v6 = vadd.f32 %v1435_v28, %v172_v4  ;;  %v303_v12 = vadd.f32 %v1437_v29, %v175_v60  ;;  %v179_v47 = vld [vmem:[#allocation2 + $0xc8] sm:$0xff]  ;;  %v181_v52 = vld [vmem:[#allocation2 + $0xd8] sm:$0xff]  ;;  %v978_v56 = vpack.c.bf16 %v1671_v22, %v1669_v21  ;;  %v351_v13 = vld [vmem:[%s1461_s5] sm:$0xff] }
  0x85   : > { %969 = vmatprep.subr.bf16.mxu0 %v968_v9  ;;  %989 = vmatprep.subr.bf16.mxu1 %v988_v46  ;;  %v996_v9 = vpack.c.bf16 %v301_v37, %v299_v1  ;;  %v176_v46 = vld [vmem:[#allocation2 + $0xb0] sm:$0xff]  ;;  %v385_v39 = vld [vmem:[%s1464_s6] sm:$0xff]  ;;  %v354_v27 = vld [vmem:[%s1461_s5 + $0x18] sm:$0xff]  ;;  %v302_v29 = vadd.f32 %v1445_v33, %v174_v58 }
  0x86   : > { %v388_v0 = vld [vmem:[%s1464_s6 + $0x18] sm:$0xff]  ;;  %v998_v28 = vpack.c.bf16 %v300_v6, %v298_v24  ;;  %v304_v30 = vadd.f32 %v1447_v34, %v176_v46  ;;  %v178_v32 = vld [vmem:[#allocation2 + $0xc0] sm:$0xff]  ;;  %v180_v59 = vld [vmem:[#allocation2 + $0xd0] sm:$0xff] }
  0x87   : > { %v183_v1 = vld [vmem:[#allocation2 + $0xe8] sm:$0xff]  ;;  %v185_v37 = vld [vmem:[#allocation2 + $0xf8] sm:$0xff]  ;;  %v420_v2 = vadd.f32 %v388_v0, %v354_v27  ;;  %v353_v4 = vld [vmem:[%s1461_s5 + $0x10] sm:$0xff] }
  0x88   : > { %971 = vmatpush1.bf16.msra.mxu0 %v970_v31  ;;  %991 = vmatpush1.bf16.msra.mxu1 %v990_v18  ;;  %v1000_v31 = vpack.c.bf16 %v305_v26, %v303_v12  ;;  %v309_v18 = vadd.f32 %v1451_v36, %v181_v52  ;;  %v387_v60 = vld [vmem:[%s1464_s6 + $0x10] sm:$0xff]  ;;  %v356_v8 = vld [vmem:[%s1461_s5 + $0x28] sm:$0xff]  ;;  %v1002_v34 = vpack.c.bf16 %v304_v30, %v302_v29  ;;  %v182_v24 = vld [vmem:[#allocation2 + $0xe0] sm:$0xff] }
  0x89   : > { %973 = vmatprep.subr.bf16.mxu0 %v972_v14  ;;  %993 = vmatprep.subr.bf16.mxu1 %v992_v62  ;;  %v307_v14 = vadd.f32 %v1449_v35, %v179_v47  ;;  %v417_v62 = vadd.f32 %v385_v39, %v351_v13  ;;  %v390_v33 = vld [vmem:[%s1464_s6 + $0x28] sm:$0xff]  ;;  %v308_v35 = vadd.f32 %v1459_v40, %v180_v59  ;;  %v184_v6 = vld [vmem:[#allocation2 + $0xf0] sm:$0xff]  ;;  %v189_v26 = vld [vmem:[#allocation2 + $0x118] sm:$0xff] }
  0x8a   : > { %v187_v12 = vld [vmem:[#allocation2 + $0x108] sm:$0xff]  ;;  %v422_v58 = vadd.f32 %v390_v33, %v356_v8  ;;  %v355_v46 = vld [vmem:[%s1461_s5 + $0x20] sm:$0xff]  ;;  %v358_v47 = vld [vmem:[%s1461_s5 + $0x38] sm:$0xff]  ;;  %v317_v39 = vadd.f32 %v1481_v51, %v189_v26 }
  0x8b   : > { %v1004_v36 = vpack.c.bf16 %v309_v18, %v307_v14  ;;  %v392_v52 = vld [vmem:[%s1464_s6 + $0x38] sm:$0xff]  ;;  %v315_v13 = vadd.f32 %v1479_v50, %v187_v12  ;;  %v186_v27 = vld [vmem:[#allocation2 + $0x100] sm:$0xff]  ;;  %v188_v0 = vld [vmem:[#allocation2 + $0x110] sm:$0xff] }
  0x8c   : > { %975 = vmatpush1.bf16.msra.mxu0 %v974_v41  ;;  %995 = vmatpush1.bf16.msra.mxu1 %v994_v23  ;;  %v306_v41 = vadd.f32 %v1455_v38, %v178_v32  ;;  %v313_v23 = vadd.f32 %v1469_v44, %v185_v37  ;;  %v389_v38 = vld [vmem:[%s1464_s6 + $0x20] sm:$0xff]  ;;  %v312_v44 = vadd.f32 %v1477_v49, %v184_v6  ;;  %v191_v29 = vld [vmem:[#allocation2 + $0x128] sm:$0xff]  ;;  %v193_v30 = vld [vmem:[#allocation2 + $0x138] sm:$0xff] }
  0x8d   : > { %977 = vmatprep.subr.bf16.mxu0 %v976_v5  ;;  %997 = vmatprep.subr.bf16.mxu1 %v996_v9  ;;  %v311_v5 = vadd.f32 %v1467_v43, %v183_v1  ;;  %v419_v9 = vadd.f32 %v387_v60, %v353_v4  ;;  %v310_v43 = vadd.f32 %v1475_v48, %v182_v24  ;;  %v357_v14 = vld [vmem:[%s1461_s5 + $0x30] sm:$0xff]  ;;  %v360_v18 = vld [vmem:[%s1461_s5 + $0x48] sm:$0xff]  ;;  %v190_v37 = vld [vmem:[#allocation2 + $0x120] sm:$0xff] }
  0x8e   : > { %v1006_v40 = vpack.c.bf16 %v308_v35, %v306_v41  ;;  %v391_v48 = vld [vmem:[%s1464_s6 + $0x30] sm:$0xff]  ;;  %v394_v32 = vld [vmem:[%s1464_s6 + $0x48] sm:$0xff]  ;;  %v314_v50 = vadd.f32 %v1485_v53, %v186_v27  ;;  %v316_v51 = vadd.f32 %v1487_v54, %v188_v0  ;;  %v1012_v59 = vpack.c.bf16 %v317_v39, %v315_v13  ;;  %v197_v8 = vld [vmem:[#allocation2 + $0x158] sm:$0xff] }
  0x8f   : > { %v1010_v49 = vpack.c.bf16 %v312_v44, %v310_v43  ;;  %v321_v1 = vadd.f32 %v1493_v57, %v193_v30  ;;  %v423_v4 = vadd.f32 %v391_v48, %v357_v14  ;;  %v195_v60 = vld [vmem:[#allocation2 + $0x148] sm:$0xff]  ;;  %v426_v33 = vadd.f32 %v394_v32, %v360_v18  ;;  %v393_v53 = vld [vmem:[%s1464_s6 + $0x40] sm:$0xff]  ;;  %v362_v41 = vld [vmem:[%s1461_s5 + $0x58] sm:$0xff] }
  0x90   : > { %979 = vmatpush1.bf16.msra.mxu0 %v978_v56  ;;  %999 = vmatpush1.bf16.msra.mxu1 %v998_v28  ;;  %v1008_v56 = vpack.c.bf16 %v313_v23, %v311_v5  ;;  %v421_v28 = vadd.f32 %v389_v38, %v355_v46  ;;  %v396_v35 = vld [vmem:[%s1464_s6 + $0x58] sm:$0xff]  ;;  %v1014_v54 = vpack.c.bf16 %v316_v51, %v314_v50  ;;  %v1909_v6 = vld [vmem:[#allocation15_spill] sm:$0xff]  ;;  %v196_v26 = vld [vmem:[#allocation2 + $0x150] sm:$0xff] }
  0x91   : > { %1001 = vmatprep.subr.bf16.mxu1 %v1000_v31  ;;  %v424_v31 = vadd.f32 %v392_v52, %v358_v47  ;;  %v1908_v23 = vld [vmem:[#allocation14_spill] sm:$0xff]  ;;  %v194_v12 = vld [vmem:[#allocation2 + $0x140] sm:$0xff]  ;;  %v199_v46 = vld [vmem:[#allocation2 + $0x168] sm:$0xff]  ;;  %v428_v47 = vadd.f32 %v396_v35, %v362_v41 }
  0x92   : > { %v323_v24 = vadd.f32 %v1908_v23, %v195_v60  ;;  %v201_v38 = vld [vmem:[#allocation2 + $0x178] sm:$0xff]  ;;  %v361_v52 = vld [vmem:[%s1461_s5 + $0x50] sm:$0xff]  ;;  %v1912_v27 = vld [vmem:[#allocation24_spill] sm:$0xff] }
  0x93   : > { %514 = vmatmul.mubr.f32.vlgmr.msra.gmra.mrb[0].mxu0 %v417_v62  ;;  %v319_v62 = vadd.f32 %v1489_v55, %v191_v29  ;;  %v318_v55 = vadd.f32 %v1502_v3, %v190_v37  ;;  %v1910_v43 = vld [vmem:[#allocation21_spill] sm:$0xff]  ;;  %v327_v0 = vadd.f32 %v1912_v27, %v199_v46  ;;  %v198_v30 = vld [vmem:[#allocation2 + $0x160] sm:$0xff]  ;;  %v203_v48 = vld [vmem:[#allocation2 + $0x188] sm:$0xff] }
  0x94   : > { %519 = vmatprep.mubr.f32.mxu0 %v420_v2  ;;  %1003 = vmatpush1.bf16.msra.mxu1 %v1002_v34  ;;  %v192_v2 = vld [vmem:[#allocation2 + $0x130] sm:$0xff]  ;;  %v359_v34 = vld [vmem:[%s1461_s5 + $0x40] sm:$0xff]  ;;  %v322_v44 = vadd.f32 %v1910_v43, %v194_v12  ;;  %v205_v18 = vld [vmem:[#allocation2 + $0x198] sm:$0xff] }
  0x95   : > { %1005 = vmatprep.subr.bf16.mxu1 %v1004_v36  ;;  %v1907_v36 = vld [vmem:[#allocation12_spill] sm:$0xff]  ;;  %v1016_v5 = vpack.c.bf16 %v321_v1, %v319_v62  ;;  %v1914_v50 = vld [vmem:[#allocation31_spill] sm:$0xff]  ;;  %v1915_v62 = vld [vmem:[#allocation33_spill] sm:$0xff] }
  0x96   : > { %v320_v57 = vadd.f32 %v1907_v36, %v192_v2  ;;  %v331_v1 = vadd.f32 %v1915_v62, %v203_v48  ;;  %v1916_v37 = vld [vmem:[#allocation34_spill] sm:$0xff]  ;;  %v204_v60 = vld [vmem:[#allocation2 + $0x190] sm:$0xff]  ;;  %v206_v36 = vld [vmem:[#allocation2 + $0x1a0] sm:$0xff] }
  0x97   : > { %520 = vmatmul.mubr.f32.gmra.mrb[2].mxu0 %v419_v9  ;;  %v325_v9 = vadd.f32 %v1909_v6, %v197_v8  ;;  %v333_v2 = vadd.f32 %v1916_v37, %v205_v18  ;;  %v207_v8 = vld [vmem:[#allocation2 + $0x1a8] sm:$0xff]  ;;  %v1920_v46 = vld [vmem:[#allocation17_spill] sm:$0xff]  ;;  %v1922_v43 = vld [vmem:[#allocation19_spill] sm:$0xff] }
  0x98   : > { %525 = vmatprep.mubr.f32.mxu0 %v422_v58  ;;  %1007 = vmatpush1.bf16.msra.mxu1 %v1006_v40  ;;  %v425_v58 = vadd.f32 %v393_v53, %v359_v34  ;;  %v395_v40 = vld [vmem:[%s1464_s6 + $0x50] sm:$0xff]  ;;  %v1018_v3 = vpack.c.bf16 %v320_v57, %v318_v55  ;;  %v1917_v34 = vld [vmem:[#allocation11_spill] sm:$0xff]  ;;  %v211_v23 = vld [vmem:[#allocation2 + $0x1c8] sm:$0xff] }
  0x99   : > { %1009 = vmatprep.subr.bf16.mxu1 %v1008_v56  ;;  %v1911_v56 = vld [vmem:[#allocation22_spill] sm:$0xff]  ;;  %v1020_v39 = vpack.c.bf16 %v325_v9, %v323_v24  ;;  %v427_v14 = vadd.f32 %v395_v40, %v361_v52  ;;  %v1028_v35 = vpack.c.bf16 %v333_v2, %v331_v1  ;;  %v208_v57 = vld [vmem:[#allocation2 + $0x1b0] sm:$0xff]  ;;  %v1919_v6 = vld [vmem:[#allocation16_spill] sm:$0xff] }
  0x9a   : > { %v324_v13 = vadd.f32 %v1911_v56, %v196_v26  ;;  %v213_v24 = vld [vmem:[#allocation2 + $0x1d8] sm:$0xff]  ;;  %v210_v26 = vld [vmem:[#allocation2 + $0x1c0] sm:$0xff]  ;;  %v1936_v48 = vld [vmem:[#allocation40_spill] sm:$0xff] }
  0x9b   : > { %526 = vmatmul.mubr.f32.gmra.mrb[4].mxu0 %v421_v28  ;;  %v1913_v28 = vld [vmem:[#allocation25_spill] sm:$0xff]  ;;  %v1921_v52 = vld [vmem:[#allocation18_spill] sm:$0xff]  ;;  %v214_v18 = vld [vmem:[#allocation2 + $0x1e0] sm:$0xff] }
  0x9c   : > { %531 = vmatprep.mubr.f32.mxu0 %v424_v31  ;;  %1011 = vmatpush1.bf16.msra.mxu1 %v1010_v49  ;;  %v329_v29 = vadd.f32 %v1913_v28, %v201_v38  ;;  %v200_v31 = vld [vmem:[#allocation2 + $0x170] sm:$0xff]  ;;  %v1022_v32 = vpack.c.bf16 %v324_v13, %v322_v44  ;;  %v326_v49 = vadd.f32 %v1574_v42, %v198_v30  ;;  %v215_v38 = vld [vmem:[#allocation2 + $0x1e8] sm:$0xff]  ;;  %v1925_v27 = vld [vmem:[#allocation26_spill] sm:$0xff] }
  0x9d   : > { %1013 = vmatprep.subr.bf16.mxu1 %v1012_v59  ;;  %v328_v51 = vadd.f32 %v1914_v50, %v200_v31  ;;  %v332_v42 = vadd.f32 %v1611_v19, %v204_v60  ;;  %v336_v19 = vadd.f32 %v1639_v10, %v208_v57  ;;  %v1923_v44 = vld [vmem:[#allocation20_spill] sm:$0xff]  ;;  %v1931_v28 = vld [vmem:[#allocation35_spill] sm:$0xff]  ;;  %v1933_v30 = vld [vmem:[#allocation37_spill] sm:$0xff] }
  0x9e   : > { %v1024_v59 = vpack.c.bf16 %v329_v29, %v327_v0  ;;  %v1930_v0 = vld [vmem:[#allocation32_spill] sm:$0xff]  ;;  %v1934_v31 = vld [vmem:[#allocation38_spill] sm:$0xff] }
  0x9f   : > { %532 = vmatmul.mubr.f32.gmra.mrb[6].mxu0 %v423_v4  ;;  %v202_v4 = vld [vmem:[#allocation2 + $0x180] sm:$0xff]  ;;  %v1026_v53 = vpack.c.bf16 %v328_v51, %v326_v49  ;;  %v1932_v29 = vld [vmem:[#allocation36_spill] sm:$0xff]  ;;  %v342_v49 = vadd.f32 %v1669_v21, %v214_v18 }
  0xa0   : > { %537 = vmatprep.mubr.f32.mxu0 %v426_v33  ;;  %1015 = vmatpush1.bf16.msra.mxu1 %v1014_v54  ;;  %v209_v33 = vld [vmem:[#allocation2 + $0x1b8] sm:$0xff]  ;;  %v330_v41 = vadd.f32 %v1609_v45, %v202_v4  ;;  %v335_v54 = vadd.f32 %v1613_v20, %v207_v8  ;;  %v334_v45 = vadd.f32 %v1637_v7, %v206_v36 }
  0xa1   : > { %1017 = vmatprep.subr.bf16.mxu1 %v1016_v5  ;;  %v337_v55 = vadd.f32 %v1615_v63, %v209_v33  ;;  %v1918_v5 = vld [vmem:[#allocation13_spill] sm:$0xff]  ;;  %v339_v20 = vadd.f32 %v1641_v11, %v211_v23  ;;  %v341_v63 = vadd.f32 %v1643_v25, %v213_v24  ;;  %v338_v7 = vadd.f32 %v1653_v15, %v210_v26  ;;  %v1926_v15 = vld [vmem:[#allocation27_spill] sm:$0xff] }
  0xa2   : > { %v1030_v9 = vpack.c.bf16 %v332_v42, %v330_v41  ;;  %v1034_v40 = vpack.c.bf16 %v336_v19, %v334_v45  ;;  %v343_v11 = vadd.f32 %v1657_v61, %v215_v38  ;;  %v1928_v61 = vld [vmem:[#allocation29_spill] sm:$0xff] }
  0xa3   : > { %538 = vmatmul.mubr.f32.gmra.mrb[8].mxu0 %v425_v58  ;;  %v1032_v12 = vpack.c.bf16 %v337_v55, %v335_v54  ;;  %v212_v58 = vld [vmem:[#allocation2 + $0x1d0] sm:$0xff] }
  0xa4   : > { %543 = vmatprep.mubr.f32.mxu0 %v428_v47  ;;  %1019 = vmatpush1.bf16.msra.mxu1 %v1018_v3  ;;  %v217_v47 = vld [vmem:[#allocation2 + $0x1f8] sm:$0xff]  ;;  %v340_v10 = vadd.f32 %v1655_v16, %v212_v58  ;;  %v1036_v3 = vpack.c.bf16 %v341_v63, %v339_v20  ;;  %v1927_v16 = vld [vmem:[#allocation28_spill] sm:$0xff] }
  0xa5   : > { %1021 = vmatprep.subr.bf16.mxu1 %v1020_v39  ;;  %v345_v25 = vadd.f32 %v1659_v17, %v217_v47  ;;  %v1924_v39 = vld [vmem:[#allocation23_spill] sm:$0xff]  ;;  %v1929_v17 = vld [vmem:[#allocation30_spill] sm:$0xff] }
  0xa6   : > { %v1038_v56 = vpack.c.bf16 %v340_v10, %v338_v7 }
  0xa7   : > { %544 = vmatmul.mubr.f32.gmra.mrb[10].mxu0 %v427_v14  ;;  %v1040_v13 = vpack.c.bf16 %v345_v25, %v343_v11  ;;  %v1935_v14 = vld [vmem:[#allocation39_spill] sm:$0xff] }
  0xa8   : > { %549 = vmatprep.mubr.f32.mxu0 %v1917_v34  ;;  %1023 = vmatpush1.bf16.msra.mxu1 %v1022_v32  ;;  %v216_v32 = vld [vmem:[#allocation2 + $0x1f0] sm:$0xff] }
  0xa9   : > { %1025 = vmatprep.subr.bf16.mxu1 %v1024_v59  ;;  %v344_v50 = vadd.f32 %v1671_v22, %v216_v32 }
  0xab   : > { %550 = vmatmul.mubr.f32.gmra.mrb[12].mxu0 %v1918_v5  ;;  %v1042_v51 = vpack.c.bf16 %v344_v50, %v342_v49 }
  0xac   : > { %555 = vmatprep.mubr.f32.mxu0 %v1919_v6  ;;  %1027 = vmatpush1.bf16.msra.mxu1 %v1026_v53 }
  0xad   : > { %1029 = vmatprep.subr.bf16.mxu1 %v1028_v35 }
  0xaf   : > { %556 = vmatmul.mubr.f32.gmra.mrb[14].mxu0 %v1920_v46 }
  0xb0   : > { %561 = vmatprep.mubr.f32.mxu0 %v1921_v52  ;;  %1031 = vmatpush1.bf16.msra.mxu1 %v1030_v9 }
  0xb1   : > { %1033 = vmatprep.subr.bf16.mxu1 %v1032_v12 }
  0xb3   : > { %562 = vmatmul.mubr.f32.gmra.mrb[16].mxu0 %v1922_v43 }
  0xb4   : > { %567 = vmatprep.mubr.f32.mxu0 %v1923_v44  ;;  %1035 = vmatpush1.bf16.msra.mxu1 %v1034_v40 }
  0xb5   : > { %1037 = vmatprep.subr.bf16.mxu1 %v1036_v3 }
  0xb7   : > { %568 = vmatmul.mubr.f32.gmra.mrb[18].mxu0 %v1924_v39 }
  0xb8   : > { %573 = vmatprep.mubr.f32.mxu0 %v1925_v27  ;;  %1039 = vmatpush1.bf16.msra.mxu1 %v1038_v56 }
  0xb9   : > { %1041 = vmatprep.subr.bf16.mxu1 %v1040_v13 }
  0xbb   : > { %574 = vmatmul.mubr.f32.gmra.mrb[20].mxu0 %v1926_v15 }
  0xbc   : > { %579 = vmatprep.mubr.f32.mxu0 %v1927_v16  ;;  %1043 = vmatpush1.bf16.msra.mxu1 %v1042_v51 }
  0xbf   : > { %580 = vmatmul.mubr.f32.gmra.mrb[22].mxu0 %v1928_v61 }
  0xc0   : > { %585 = vmatprep.mubr.f32.mxu0 %v1929_v17 }
  0xc3   : > { %586 = vmatmul.mubr.f32.gmra.mrb[24].mxu0 %v1930_v0 }
  0xc4   : > { %591 = vmatprep.mubr.f32.mxu0 %v1931_v28 }
  0xc7   : > { %592 = vmatmul.mubr.f32.gmra.mrb[26].mxu0 %v1932_v29 }
  0xc8   : > { %597 = vmatprep.mubr.f32.mxu0 %v1933_v30 }
  0xcb   : > { %598 = vmatmul.mubr.f32.gmra.mrb[28].mxu0 %v1934_v31 }
  0xcc   : > { %603 = vmatprep.mubr.f32.mxu0 %v1935_v14 }
  0xcf   : > { %604 = vmatmul.mubr.f32.gmra.mrb[30].mxu0 %v1936_v48 }
 0x166   : > { %v515_v59 = vpop.f32.mrb[0].mxu0 }
 0x167   : > { %v517_v62 = vpop.f32.mrb[1].mxu0 }
 0x168   : > { %674 = vmatprep.mubr.f32.mxu1 %v517_v62 }
 0x169   : > { %675 = vmatmul.mubr.f32.vlgmr.msra.gmra.mrb[0].mxu1 %v515_v59 }
 0x16a   : > { %v521_v1 = vpop.f32.mrb[2].mxu0 }
 0x16b   : > { %v523_v37 = vpop.f32.mrb[3].mxu0 }
 0x16c   : > { %680 = vmatprep.mubr.f32.mxu1 %v523_v37 }
 0x16d   : > { %681 = vmatmul.mubr.f32.gmra.mrb[2].mxu1 %v521_v1 }
 0x16e   : > { %v527_v2 = vpop.f32.mrb[4].mxu0 }
 0x16f   : > { %v529_v4 = vpop.f32.mrb[5].mxu0 }
 0x170   : > { %686 = vmatprep.mubr.f32.mxu1 %v529_v4 }
 0x171   : > { %687 = vmatmul.mubr.f32.gmra.mrb[4].mxu1 %v527_v2 }
 0x172   : > { %v533_v60 = vpop.f32.mrb[6].mxu0 }
 0x173   : > { %v535_v8 = vpop.f32.mrb[7].mxu0 }
 0x174   : > { %692 = vmatprep.mubr.f32.mxu1 %v535_v8 }
 0x175   : > { %693 = vmatmul.mubr.f32.gmra.mrb[6].mxu1 %v533_v60 }
 0x176   : > { %v539_v21 = vpop.f32.mrb[8].mxu0 }
 0x177   : > { %v541_v22 = vpop.f32.mrb[9].mxu0 }
 0x178   : > { %698 = vmatprep.mubr.f32.mxu1 %v541_v22 }
 0x179   : > { %699 = vmatmul.mubr.f32.gmra.mrb[8].mxu1 %v539_v21 }
 0x17a   : > { %v545_v33 = vpop.f32.mrb[10].mxu0 }
 0x17b   : > { %v547_v34 = vpop.f32.mrb[11].mxu0 }
 0x17c   : > { %704 = vmatprep.mubr.f32.mxu1 %v547_v34 }
 0x17d   : > { %705 = vmatmul.mubr.f32.gmra.mrb[10].mxu1 %v545_v33 }
 0x17e   : > { %v551_v53 = vpop.f32.mrb[12].mxu0 }
 0x17f   : > { %v553_v41 = vpop.f32.mrb[13].mxu0 }
 0x180   : > { %710 = vmatprep.mubr.f32.mxu1 %v553_v41 }
 0x181   : > { %711 = vmatmul.mubr.f32.gmra.mrb[12].mxu1 %v551_v53 }
 0x182   : > { %v557_v42 = vpop.f32.mrb[14].mxu0 }
 0x183   : > { %v559_v35 = vpop.f32.mrb[15].mxu0 }
 0x184   : > { %716 = vmatprep.mubr.f32.mxu1 %v559_v35 }
 0x185   : > { %717 = vmatmul.mubr.f32.gmra.mrb[14].mxu1 %v557_v42 }
 0x186   : > { %v563_v54 = vpop.f32.mrb[16].mxu0 }
 0x187   : > { %v565_v55 = vpop.f32.mrb[17].mxu0 }
 0x188   : > { %722 = vmatprep.mubr.f32.mxu1 %v565_v55 }
 0x189   : > { %723 = vmatmul.mubr.f32.gmra.mrb[16].mxu1 %v563_v54 }
 0x18a   : > { %v569_v36 = vpop.f32.mrb[18].mxu0 }
 0x18b   : > { %v571_v57 = vpop.f32.mrb[19].mxu0 }
 0x18c   : > { %728 = vmatprep.mubr.f32.mxu1 %v571_v57 }
 0x18d   : > { %729 = vmatmul.mubr.f32.gmra.mrb[18].mxu1 %v569_v36 }
 0x18e   : > { %v575_v5 = vpop.f32.mrb[20].mxu0 }
 0x18f   : > { %v577_v23 = vpop.f32.mrb[21].mxu0 }
 0x190   : > { %734 = vmatprep.mubr.f32.mxu1 %v577_v23 }
 0x191   : > { %735 = vmatmul.mubr.f32.gmra.mrb[20].mxu1 %v575_v5 }
 0x192   : > { %v581_v24 = vpop.f32.mrb[22].mxu0 }
 0x193   : > { %v583_v6 = vpop.f32.mrb[23].mxu0 }
 0x194   : > { %740 = vmatprep.mubr.f32.mxu1 %v583_v6 }
 0x195   : > { %741 = vmatmul.mubr.f32.gmra.mrb[22].mxu1 %v581_v24 }
 0x196   : > { %v587_v9 = vpop.f32.mrb[24].mxu0 }
 0x197   : > { %v589_v45 = vpop.f32.mrb[25].mxu0 }
 0x198   : > { %746 = vmatprep.mubr.f32.mxu1 %v589_v45 }
 0x199   : > { %747 = vmatmul.mubr.f32.gmra.mrb[24].mxu1 %v587_v9 }
 0x19a   : > { %v593_v19 = vpop.f32.mrb[26].mxu0 }
 0x19b   : > { %v595_v12 = vpop.f32.mrb[27].mxu0 }
 0x19c   : > { %752 = vmatprep.mubr.f32.mxu1 %v595_v12 }
 0x19d   : > { %753 = vmatmul.mubr.f32.gmra.mrb[26].mxu1 %v593_v19 }
 0x19e   : > { %v599_v20 = vpop.f32.mrb[28].mxu0 }
 0x19f   : > { %v601_v63 = vpop.f32.mrb[29].mxu0 }
 0x1a0   : > { %758 = vmatprep.mubr.f32.mxu1 %v601_v63 }
 0x1a1   : > { %759 = vmatmul.mubr.f32.gmra.mrb[28].mxu1 %v599_v20 }
 0x1a2   : > { %v605_v26 = vpop.f32.mrb[30].mxu0 }
 0x1a3   : > { %v607_v58 = vpop.f32.mrb[31].mxu0 }
 0x1a4   : > { %764 = vmatprep.mubr.f32.mxu1 %v607_v58 }
 0x1a5   : > { %765 = vmatmul.mubr.f32.gmra.mrb[30].mxu1 %v605_v26 }
 0x23c   : > { %v676_v46 = vpop.f32.mrb[0].mxu1 }
 0x23d   : > { %771 = vst [vmem:[%s1766_s14] sm:$0xff] %v676_v46  ;;  %v678_v38 = vpop.f32.mrb[1].mxu1 }
 0x23e   : > { %772 = vst [vmem:[%s1766_s14 + $0x8] sm:$0xff] %v678_v38 }
 0x240   : > { %v682_v47 = vpop.f32.mrb[2].mxu1 }
 0x241   : > { %773 = vst [vmem:[%s1766_s14 + $0x10] sm:$0xff] %v682_v47  ;;  %v684_v52 = vpop.f32.mrb[3].mxu1 }
 0x242   : > { %774 = vst [vmem:[%s1766_s14 + $0x18] sm:$0xff] %v684_v52 }
 0x244   : > { %v688_v40 = vpop.f32.mrb[4].mxu1 }
 0x245   : > { %775 = vst [vmem:[%s1766_s14 + $0x20] sm:$0xff] %v688_v40  ;;  %v690_v7 = vpop.f32.mrb[5].mxu1 }
 0x246   : > { %776 = vst [vmem:[%s1766_s14 + $0x28] sm:$0xff] %v690_v7 }
 0x248   : > { %v694_v10 = vpop.f32.mrb[6].mxu1 }
 0x249   : > { %777 = vst [vmem:[%s1766_s14 + $0x30] sm:$0xff] %v694_v10  ;;  %v696_v3 = vpop.f32.mrb[7].mxu1 }
 0x24a   : > { %778 = vst [vmem:[%s1766_s14 + $0x38] sm:$0xff] %v696_v3 }
 0x24c   : > { %v700_v11 = vpop.f32.mrb[8].mxu1 }
 0x24d   : > { %779 = vst [vmem:[%s1766_s14 + $0x40] sm:$0xff] %v700_v11  ;;  %v702_v25 = vpop.f32.mrb[9].mxu1 }
 0x24e   : > { %780 = vst [vmem:[%s1766_s14 + $0x48] sm:$0xff] %v702_v25 }
 0x250   : > { %v706_v43 = vpop.f32.mrb[10].mxu1 }
 0x251   : > { %781 = vst [vmem:[%s1766_s14 + $0x50] sm:$0xff] %v706_v43  ;;  %v708_v44 = vpop.f32.mrb[11].mxu1 }
 0x252   : > { %782 = vst [vmem:[%s1766_s14 + $0x58] sm:$0xff] %v708_v44 }
 0x254   : > { %v712_v56 = vpop.f32.mrb[12].mxu1 }
 0x255   : > { %783 = vst [vmem:[%s1766_s14 + $0x60] sm:$0xff] %v712_v56  ;;  %v714_v13 = vpop.f32.mrb[13].mxu1 }
 0x256   : > { %784 = vst [vmem:[%s1766_s14 + $0x68] sm:$0xff] %v714_v13 }
 0x258   : > { %v718_v39 = vpop.f32.mrb[14].mxu1 }
 0x259   : > { %785 = vst [vmem:[%s1766_s14 + $0x70] sm:$0xff] %v718_v39  ;;  %v720_v27 = vpop.f32.mrb[15].mxu1 }
 0x25a   : > { %786 = vst [vmem:[%s1766_s14 + $0x78] sm:$0xff] %v720_v27 }
 0x25c   : > { %v724_v15 = vpop.f32.mrb[16].mxu1 }
 0x25d   : > { %787 = vst [vmem:[%s1766_s14 + $0x80] sm:$0xff] %v724_v15  ;;  %v726_v16 = vpop.f32.mrb[17].mxu1 }
 0x25e   : > { %788 = vst [vmem:[%s1766_s14 + $0x88] sm:$0xff] %v726_v16 }
 0x260   : > { %v730_v61 = vpop.f32.mrb[18].mxu1 }
 0x261   : > { %789 = vst [vmem:[%s1766_s14 + $0x90] sm:$0xff] %v730_v61  ;;  %v732_v17 = vpop.f32.mrb[19].mxu1 }
 0x262   : > { %790 = vst [vmem:[%s1766_s14 + $0x98] sm:$0xff] %v732_v17 }
 0x264   : > { %v736_v0 = vpop.f32.mrb[20].mxu1 }
 0x265   : > { %791 = vst [vmem:[%s1766_s14 + $0xa0] sm:$0xff] %v736_v0  ;;  %v738_v28 = vpop.f32.mrb[21].mxu1 }
 0x266   : > { %792 = vst [vmem:[%s1766_s14 + $0xa8] sm:$0xff] %v738_v28 }
 0x268   : > { %v742_v29 = vpop.f32.mrb[22].mxu1 }
 0x269   : > { %793 = vst [vmem:[%s1766_s14 + $0xb0] sm:$0xff] %v742_v29  ;;  %v744_v30 = vpop.f32.mrb[23].mxu1 }
 0x26a   : > { %794 = vst [vmem:[%s1766_s14 + $0xb8] sm:$0xff] %v744_v30 }
 0x26c   : > { %v748_v31 = vpop.f32.mrb[24].mxu1 }
 0x26d   : > { %795 = vst [vmem:[%s1766_s14 + $0xc0] sm:$0xff] %v748_v31  ;;  %v750_v14 = vpop.f32.mrb[25].mxu1 }
 0x26e   : > { %796 = vst [vmem:[%s1766_s14 + $0xc8] sm:$0xff] %v750_v14 }
 0x270   : > { %v754_v48 = vpop.f32.mrb[26].mxu1 }
 0x271   : > { %797 = vst [vmem:[%s1766_s14 + $0xd0] sm:$0xff] %v754_v48  ;;  %v756_v18 = vpop.f32.mrb[27].mxu1 }
 0x272   : > { %798 = vst [vmem:[%s1766_s14 + $0xd8] sm:$0xff] %v756_v18 }
 0x274   : > { %v760_v32 = vpop.f32.mrb[28].mxu1 }
 0x275   : > { %799 = vst [vmem:[%s1766_s14 + $0xe0] sm:$0xff] %v760_v32  ;;  %v762_v49 = vpop.f32.mrb[29].mxu1 }
 0x276   : > { %800 = vst [vmem:[%s1766_s14 + $0xe8] sm:$0xff] %v762_v49 }
 0x278   : > { %v766_v50 = vpop.f32.mrb[30].mxu1 }
 0x279   : > { %801 = vst [vmem:[%s1766_s14 + $0xf0] sm:$0xff] %v766_v50  ;;  %v768_v51 = vpop.f32.mrb[31].mxu1 }
 0x27a   : > { %802 = vst [vmem:[%s1766_s14 + $0xf8] sm:$0xff] %v768_v51 }
 0x27b   : > { %1177 = shalt.err (!%p1174_p8)
}
 0x27c   : > { %s1178_s3 = scalar_lea.hbm %s1803_s27, 4096  ;;  %s1182_s24 = scalar_lea.hbm %s1854_s2, 8192 }
 0x27d   : > { %p1179_p11 = scmp.ne.s32.totalorder %s1803_s27, %s1178_s3  ;;  %p1183_p0 = scmp.lt.u32.totalorder %s1803_s27, %s1854_s2 }
 0x27e   : > { %p1184_p6 = scmp.lt.u32.totalorder %s1182_s24, %s1178_s3  ;;  %p1186_p12 = scmp.lt.u32.totalorder %s1178_s3, %s1803_s27 }
 0x27f   : > { %p1180_p13 = pnand %p1179_p11, %p1937_p10 }
 0x280   : > { %p1185_p9 = por %p1184_p6, %p1183_p0 }
 0x281   : > { %p1181_p5 = pneg %p1180_p13 }
 0x282   : > { %p1187_p1 = por %p1186_p12, %p1185_p9 }
 0x284   : > { %p1188_p2 = pnand %p1187_p1, %p1181_p5 }
 0x286   : > { %1191 = shalt.err (!%p1188_p2)
}
 0x287   : > { %s1241_s6 = smov 256   ;;  %s1242_s7 = smov 16  }
 0x288   : > { %1052 = dma.vmem_to_hbm [thread:$0]  (%p1937_p10), %s1805_s17, 4096, %s1803_s27, %s1811_s13, %s1241_s6, %s1241_s6, %s1242_s7  }
 0x289 PF: > { %p1069_p3 = scmp.ge.s32.totalorder %s1234_s12, 2  ;;  %s833_s8 = sand.u32 1, %s1222_s9  }
 0x28a   : > { %p1938_p4 = scmp.ne.s32.totalorder %s1869_s20, 0  ;;  %s834_s14 = scalar_lea.sflag [#allocation4], %s833_s8 }
 0x28c   : > { %p1062_p7 = pnand %p1069_p3, %p1938_p4 }
 0x28e   : > { %1217 = dma.done.wait (!%p1062_p7), %s834_s14, 4096  }
 0x28f   : > { %1219 = vsyncadd (!%p1062_p7), %s834_s14, 4294963200  ;;  %p14_p8 = scmp.ge.s32.totalorder %s1283_s15, 4   ;;  %s1939_s9 = smov %s1226_s10 }
 0x290   : > { %s1940_s10 = smov %s1230_s11  ;;  %s1941_s11 = smov %s1294_s18 }
 0x291   : > { %s1942_s12 = smov %s1283_s15  ;;  %16 = sbr.rel (!%p14_p8) target bundleno = 5 (0x5), region = 71 }
 0x298   :  { %839 = vsyncpa [#allocation3], 1 }
 0x299   :  { %841 = vsyncpa [#allocation3 + $0x1], 1 }
 0x29a   :  { %842 = vsyncpa [#allocation6], 1 }
 0x29b   :  { %843 = vsyncpa [#allocation4], 1 }
 0x29c   :  { %845 = vsyncpa [#allocation4 + $0x1], 1 }

</bundles_post_ra>
